<compile_context>
chip_gen: v7x
topology: tpu7x:2x2x1
jax: 0.10.0
libtpu: 0.0.40
codegen_flags: <defaults>
</compile_context>

<pallas_src>
import jax
import jax.numpy as jnp
from jax.experimental import pallas as pl
from jax.experimental.pallas import tpu as pltpu

EPS = 1e-5  # PyTorch BatchNorm2d default


def _round_up(x, mult):
    return ((x + mult - 1) // mult) * mult


def _cdiv(a, b):
    return -(-a // b)


# ----------------------------- kernels --------------------------------------
def _stats_kernel(w_ref, p_ref, stats_ref):
    """Path A pass 1: per-tile per-channel (sum, sum_sq); conv tile NOT stored."""
    conv = jnp.dot(w_ref[...], p_ref[0],
                   preferred_element_type=jnp.float32)          # (C_out, TM) f32
    s = jnp.sum(conv, axis=1, keepdims=True)                     # (C_out, 1)
    ss = jnp.sum(conv * conv, axis=1, keepdims=True)             # (C_out, 1)
    stats_ref[...] = jnp.concatenate([s, ss], axis=1)[None]      # (1, C_out, 2)


def _conv_stats_kernel(w_ref, p_ref, conv_ref, stats_ref):
    """Path B pass 1: bf16 conv tile + f32 (sum, sum_sq) partials (one pass)."""
    conv = jnp.dot(w_ref[...], p_ref[0],
                   preferred_element_type=jnp.float32)           # (C_out, TM) f32
    conv_ref[0] = conv.astype(conv_ref.dtype)                    # bf16 writeback
    s = jnp.sum(conv, axis=1, keepdims=True)
    ss = jnp.sum(conv * conv, axis=1, keepdims=True)
    stats_ref[...] = jnp.concatenate([s, ss], axis=1)[None]


def _conv_bn_relu_kernel(w_ref, p_ref, sc_ref, out_ref):
    """Path A pass 2: recompute conv from bf16 patches, fuse scale/shift + ReLU."""
    conv = jnp.dot(w_ref[...], p_ref[0],
                   preferred_element_type=jnp.float32)           # (C_out, TM) f32
    sc = sc_ref[...]                                             # (C_out, 2)
    y = conv * sc[:, 0:1] + sc[:, 1:2]
    out_ref[0] = jnp.maximum(y, 0.0).astype(out_ref.dtype)


def _bn_relu_kernel(conv_ref, sc_ref, out_ref):
    """Path B pass 2: read bf16 conv tile, fuse scale/shift + ReLU."""
    conv = conv_ref[0].astype(jnp.float32)                       # (C_out, TM)
    sc = sc_ref[...]
    y = conv * sc[:, 0:1] + sc[:, 1:2]
    out_ref[0] = jnp.maximum(y, 0.0).astype(out_ref.dtype)


# ----------------------------- wrapper ---------------------------------------
def _im2col_per_image(x_nchw, kh, kw, stride, pad, ohw_pad, dtype):
    """Per-image transposed im2col: (N, K, OHW_pad), K = C_in*KH*KW (c, kh, kw)."""
    n, c, h, w = x_nchw.shape
    xp = jnp.pad(x_nchw, ((0, 0), (0, 0), (pad, pad), (pad, pad)))
    oh = (h + 2 * pad - kh) // stride + 1
    ow = (w + 2 * pad - kw) // stride + 1
    taps = []
    for i in range(kh):
        for j in range(kw):
            taps.append(xp[:, :, i:i + stride * oh:stride, j:j + stride * ow:stride])
    p = jnp.stack(taps, axis=2)                     # (N, C, KH*KW, OH, OW)
    p = p.reshape(n, c * kh * kw, oh * ow)          # (N, K, OH*OW)
    if ohw_pad != oh * ow:
        p = jnp.pad(p, ((0, 0), (0, 0), (0, ohw_pad - oh * ow)))
    return p.astype(dtype)


def _choose_tiles(ohw, kdim, c_out, tile_m, vmem_budget_bytes=12 * 1024 * 1024):
    """TM multiple of 128, <= target, double-buffered working set under budget,
    and tiles laid so per-image lane padding is minimal (tiles * TM >= OHW)."""
    ohw128 = _round_up(ohw, 128)
    # worst per-column bytes across passes/paths, double-buffered:
    # bf16 patches + bf16 conv intermediate + f32 output
    per_col = 2 * (2 * kdim + 2 * c_out + 4 * c_out)
    max_tm = max(128, (vmem_budget_bytes // per_col) // 128 * 128)
    target = max(128, min(_round_up(tile_m, 128), max_tm))
    tiles = _cdiv(ohw128, target)
    tm = _round_up(_cdiv(ohw128, tiles), 128)
    return tm, tiles, tm * tiles


def conv_block_forward(x_nchw, w_hwio, b, gamma, beta, *, stride=2, pad=1,
                       tile_m=8192, compute_dtype=jnp.bfloat16, recompute=None):
    """ConvBlock forward. x_nchw: (N, C_in, H, W); w_hwio: (KH, KW, C_in, C_out)."""
    # Conv bias is exactly cancelled by batch-stat BN's mean subtraction; dropping
    # it also keeps the zero-padded lanes neutral for the sum / sum_sq stats.
    del b

    n, c_in, h, w_in = x_nchw.shape
    kh, kw, _, c_out = w_hwio.shape
    oh = (h + 2 * pad - kh) // stride + 1
    ow = (w_in + 2 * pad - kw) // stride + 1
    ohw = oh * ow
    kdim = c_in * kh * kw
    m = n * ohw                                   # BN population size (unpadded)

    if recompute is None:
        # Recompute the short-K matmul in pass 2 when re-reading the bf16 patches
        # (2*K B/col) beats a bf16 conv round trip (4*C_out B/col).
        recompute = kdim < 2 * c_out

    tm, tiles, ohw_pad = _choose_tiles(ohw, kdim, c_out, tile_m)

    # Lane-dense, image-major patches so the kernel can write N-C-(HW) directly.
    patches = _im2col_per_image(x_nchw, kh, kw, stride, pad, ohw_pad, compute_dtype)
    w2d = jnp.transpose(w_hwio, (3, 2, 0, 1)).reshape(c_out, kdim).astype(compute_dtype)

    grid = (n, tiles)
    cparams = pltpu.CompilerParams(
        dimension_semantics=("parallel", "parallel"),
        vmem_limit_bytes=32 * 1024 * 1024,
    )
    w_spec = pl.BlockSpec((c_out, kdim), lambda i, t: (0, 0))        # resident
    p_spec = pl.BlockSpec((1, kdim, tm), lambda i, t: (i, 0, t))     # patches tile
    o_spec = pl.BlockSpec((1, c_out, tm), lambda i, t: (i, 0, t))    # NC(HW) tile
    stats_spec = pl.BlockSpec((1, c_out, 2), lambda i, t: (i * tiles + t, 0, 0))
    stats_shape = jax.ShapeDtypeStruct((n * tiles, c_out, 2), jnp.float32)

    # ---- pass 1: BN stat partials (Path A) or bf16 conv + partials (Path B) --
    if recompute:
        stats = pl.pallas_call(
            _stats_kernel,
            out_shape=stats_shape,
            grid=grid,
            in_specs=[w_spec, p_spec],
            out_specs=stats_spec,
            compiler_params=cparams,
        )(w2d, patches)
        conv_bf16 = None
    else:
        conv_bf16, stats = pl.pallas_call(
            _conv_stats_kernel,
            out_shape=(
                jax.ShapeDtypeStruct((n, c_out, ohw_pad), jnp.bfloat16),
                stats_shape,
            ),
            grid=grid,
            in_specs=[w_spec, p_spec],
            out_specs=(o_spec, stats_spec),
            compiler_params=cparams,
        )(w2d, patches)

    # ---- tiny reduction: fold mean/var/gamma/beta into one scale/shift ------
    sums = jnp.sum(stats, axis=0)                  # (C_out, 2)
    mean = sums[:, 0] / m
    var = jnp.maximum(sums[:, 1] / m - mean * mean, 0.0)
    inv_std = jax.lax.rsqrt(var + EPS)
    scale = gamma.astype(jnp.float32) * inv_std
    shift = beta.astype(jnp.float32) - mean * scale
    scale_shift = jnp.stack([scale, shift], axis=1)   # (C_out, 2), one resident block
    ss_spec = pl.BlockSpec((c_out, 2), lambda i, t: (0, 0))

    # ---- pass 2: fused (re)conv + normalize + ReLU, written in NC(HW) layout -
    out_shape = jax.ShapeDtypeStruct((n, c_out, ohw_pad), jnp.float32)
    if recompute:
        out_full = pl.pallas_call(
            _conv_bn_relu_kernel,
            out_shape=out_shape,
            grid=grid,
            in_specs=[w_spec, p_spec, ss_spec],
            out_specs=o_spec,
            compiler_params=cparams,
        )(w2d, patches, scale_shift)
    else:
        out_full = pl.pallas_call(
            _bn_relu_kernel,
            out_shape=out_shape,
            grid=grid,
            in_specs=[o_spec, ss_spec],
            out_specs=o_spec,
            compiler_params=cparams,
        )(conv_bf16, scale_shift)

    out = out_full if ohw_pad == ohw else out_full[:, :, :ohw]
    return out.reshape(n, c_out, oh, ow)           # already NCHW: no transpose


# ----------------------------- references ------------------------------------
def _reference(x, w, b, gamma, beta, *, stride=2, pad=1):
    """Strict f32 module semantics (lax conv + bias + batch-stat BN + ReLU)."""
    conv = jax.lax.conv_general_dilated(
        x, w, window_strides=(stride, stride),
        padding=[(pad, pad), (pad, pad)],
        dimension_numbers=("NCHW", "HWIO", "NCHW"),
        preferred_element_type=jnp.float32,
    ) + b.reshape(1, -1, 1, 1)
    mean = jnp.mean(conv, axis=(0, 2, 3), keepdims=True)
    var = jnp.mean((conv - mean) ** 2, axis=(0, 2, 3), keepdims=True)
    xhat = (conv - mean) * jax.lax.rsqrt(var + EPS)
    out = xhat * gamma.reshape(1, -1, 1, 1) + beta.reshape(1, -1, 1, 1)
    return jnp.maximum(out, 0.0)


def _matched_reference(x, w, gamma, beta, *, stride=2, pad=1,
                       compute_dtype=jnp.bfloat16, store_dtype=None):
    """Mirrors the kernel numerics: bf16 conv operands / f32 accumulation, no
    bias (cancelled by the batch mean), one-pass stats from the f32 conv, and
    optional bf16 rounding of the normalized input (Path B intermediate)."""
    conv = jax.lax.conv_general_dilated(
        x.astype(compute_dtype), w.astype(compute_dtype),
        window_strides=(stride, stride),
        padding=[(pad, pad), (pad, pad)],
        dimension_numbers=("NCHW", "HWIO", "NCHW"),
        preferred_element_type=jnp.float32,
    )
    mean = jnp.mean(conv, axis=(0, 2, 3))
    var = jnp.maximum(jnp.mean(conv * conv, axis=(0, 2, 3)) - mean * mean, 0.0)
    inv_std = jax.lax.rsqrt(var + EPS)
    scale = (gamma * inv_std).reshape(1, -1, 1, 1)
    shift = (beta - mean * gamma * inv_std).reshape(1, -1, 1, 1)
    c = conv if store_dtype is None else conv.astype(store_dtype).astype(jnp.float32)
    return jnp.maximum(c * scale + shift, 0.0)


if __name__ == "__main__":
    key = jax.random.PRNGKey(0)
    k_x, k_w, k_b, k_g, k_be = jax.random.split(key, 5)

    N, C_IN, H, W = 2, 4, 16, 16
    C_OUT, KH, KW = 8, 3, 3

    x = jax.random.normal(k_x, (N, C_IN, H, W), dtype=jnp.float32)
    w = jax.random.normal(k_w, (KH, KW, C_IN, C_OUT), dtype=jnp.float32) * 0.1
    b = jax.random.normal(k_b, (C_OUT,), dtype=jnp.float32) * 0.1
    gamma = 1.0 + 0.1 * jax.random.normal(k_g, (C_OUT,), dtype=jnp.float32)
    beta = 0.1 * jax.random.normal(k_be, (C_OUT,), dtype=jnp.float32)

    ref_f32 = _reference(x, w, b, gamma, beta)

    # Exercise both paths: stats-only + recompute (Path A) and the bf16
    # conv-intermediate variant (Path B, which the heuristic picks here).
    for recompute in (True, False):
        out = conv_block_forward(x, w, b, gamma, beta, recompute=recompute)
        jax.block_until_ready(out)
        assert out.shape == (N, C_OUT, H // 2, W // 2), out.shape

        # Implementation check vs. a precision-matched reference.
        if recompute:
            ref_m = _matched_reference(x, w, gamma, beta, store_dtype=None)
            atol, rtol = 2e-3, 2e-3
        else:
            ref_m = _matched_reference(x, w, gamma, beta, store_dtype=jnp.bfloat16)
            # looser: a boundary flip in the bf16 conv-intermediate rounding is
            # one bf16 ulp of the conv value, scaled by gamma/std.
            atol, rtol = 5e-3, 2e-2
        assert jnp.allclose(out, ref_m, atol=atol, rtol=rtol), \
            f"mismatch vs precision-matched reference (recompute={recompute})"

        # Fidelity check vs. strict f32 module semantics (only bf16 rounding of
        # conv operands / intermediate separates the two).
        assert jnp.allclose(out, ref_f32, atol=1.5e-1, rtol=5e-2), \
            f"mismatch vs f32 reference (recompute={recompute})"

    print("KERNEL_OK")
</pallas_src>

<mosaic_0001>
module attributes {stable_mosaic.version = 11 : i64} {
  func.func @_stats_kernel(%arg0: i32, %arg1: i32, %arg2: memref<8x36xbf16, #tpu.memory_space<vmem>>, %arg3: memref<1x36x128xbf16, #tpu.memory_space<vmem>>, %arg4: memref<1x8x2xf32, #tpu.memory_space<vmem>>) attributes {dimension_semantics = [#tpu.dimension_semantics<parallel>, #tpu.dimension_semantics<parallel>], iteration_bounds = array<i64: 2, 1>, scalar_prefetch = 0 : i64, scratch_operands = 0 : i64, tpu.core_type = #tpu.core_type<tc>, window_params = [{pipeline_mode = #tpu.pipeline_mode<synchronous>, transform_indices = @transform_0, window_bounds = array<i64: 8, 36>}, {transform_indices = @transform_1, window_bounds = array<i64: 1, 36, 128>}, {transform_indices = @transform_2, window_bounds = array<i64: 1, 8, 2>}]} {
    %c0 = arith.constant 0 : index
    %c0_0 = arith.constant 0 : index
    %0 = vector.load %arg2[%c0, %c0_0] : memref<8x36xbf16, #tpu.memory_space<vmem>>, vector<8x36xbf16>
    %c0_1 = arith.constant 0 : index
    %c0_2 = arith.constant 0 : index
    %c0_3 = arith.constant 0 : index
    %1 = vector.load %arg3[%c0_1, %c0_2, %c0_3] : memref<1x36x128xbf16, #tpu.memory_space<vmem>>, vector<1x36x128xbf16>
    %2 = vector.shape_cast %1 : vector<1x36x128xbf16> to vector<36x128xbf16>
    %cst = arith.constant dense<0.000000e+00> : vector<8x128xf32>
    %3 = tpu.matmul %0, %2, %cst {dimension_numbers = #tpu.dot_dimension_numbers<[1], [0], [0], [1], [0, 0, 1, 1], [], []>} : vector<8x36xbf16>, vector<36x128xbf16>, vector<8x128xf32> -> vector<8x128xf32>
    %cst_4 = arith.constant dense<0.000000e+00> : vector<8xf32>
    %4 = vector.multi_reduction <add>, %3, %cst_4 [1] : vector<8x128xf32> to vector<8xf32>
    %5 = vector.shape_cast %4 : vector<8xf32> to vector<8x1xf32>
    %6 = arith.mulf %3, %3 : vector<8x128xf32>
    %cst_5 = arith.constant dense<0.000000e+00> : vector<8xf32>
    %7 = vector.multi_reduction <add>, %6, %cst_5 [1] : vector<8x128xf32> to vector<8xf32>
    %8 = vector.shape_cast %7 : vector<8xf32> to vector<8x1xf32>
    %9 = tpu.concatenate %5, %8 in 1 : vector<8x1xf32>, vector<8x1xf32> -> vector<8x2xf32>
    %10 = vector.shape_cast %9 : vector<8x2xf32> to vector<1x8x2xf32>
    %c0_6 = arith.constant 0 : index
    %c0_7 = arith.constant 0 : index
    %c0_8 = arith.constant 0 : index
    %11 = vector.load %arg4[%c0_6, %c0_7, %c0_8] : memref<1x8x2xf32, #tpu.memory_space<vmem>>, vector<1x8x2xf32>
    tpu.vector_store %arg4[%c0_6, %c0_7, %c0_8], %10 {strides = array<i32>} : memref<1x8x2xf32, #tpu.memory_space<vmem>>, vector<1x8x2xf32>,
    return
  }
  func.func @transform_0(%arg0: i32, %arg1: i32) -> (i32, i32) {
    %c0_i32 = arith.constant 0 : i32
    %c0_i32_0 = arith.constant 0 : i32
    %c0_i32_1 = arith.constant 0 : i32
    return %c0_i32, %c0_i32_0 : i32, i32
  }
  func.func @transform_1(%arg0: i32, %arg1: i32) -> (i32, i32, i32) {
    %c0_i32 = arith.constant 0 : i32
    %c0_i32_0 = arith.constant 0 : i32
    return %arg0, %c0_i32, %arg1 : i32, i32, i32
  }
  func.func @transform_2(%arg0: i32, %arg1: i32) -> (i32, i32, i32) {
    %c1_i32 = arith.constant 1 : i32
    %0 = arith.muli %arg0, %c1_i32 : i32
    %1 = arith.addi %0, %arg1 : i32
    %c0_i32 = arith.constant 0 : i32
    %c0_i32_0 = arith.constant 0 : i32
    %c0_i32_1 = arith.constant 0 : i32
    return %1, %c0_i32, %c0_i32_0 : i32, i32, i32
  }
}

</mosaic_0001>

<bundles_post_ra>
// kernel: tpu_custom_call.1
= control target key start
LH: loop header
LB: loop body
LE: loop exit
PB: predicated region body
PF: predicated region fallthrough
CT: control target
= control target key end

     0   :  { %s418_s9 = smov 0   ;;  %s420_s10 = smov 0   ;;  %s454_s0 = inlined_call_operand.vmem [shape: bf16[8,36], index: 0, kind: input, shape index: {}]   ;;  %s455_s1 = inlined_call_operand.vmem [shape: bf16[2,36,128], index: 1, kind: input, shape index: {}]   ;;  %s456_s2 = inlined_call_operand.vmem [shape: f32[2,8,2], index: 2, kind: output, shape index: {}]  }
   0x1   :  { %s422_s11 = smov 0  }
   0x2 LB: > { %s24_s12 = sadd.s32 1, %s395_s10  ;;  %p324_p0 = scmp.ge.s32.totalorder %s399_s11, 1  ;;  %s399_s11 = sphi %s422_s11, %s12_s11   ;;  %s395_s10 = sphi %s420_s10, %s458_s10   ;;  %s391_s9 = sphi %s418_s9, %s457_s9  }
   0x3   : > { %p26_p1 = scmp.ge.s32.totalorder %s24_s12, 2  ;;  %p131_p2 = scmp.lt.s32.totalorder %s399_s11, 3 }
   0x5   : > { %s460_s12 = smov (%p26_p1, %s24_s12), 0  ;;  %p132_p3 = pnand %p324_p0, %p131_p2 }
   0x6   : > { %p156_p4 = scmp.lt.s32.totalorder (!%p132_p3), %s391_s9, 1  ;;  %v401_v0 = vmov (!%p132_p3), 0.0   ;;  %vm402_vm0 = vmmov (!%p132_p3), 0   ;;  %vm196_vm1 = vcmask (!%p132_p3), 1041408   ;;  %v171_v5 = vld [vmem:[%s454_s0] sm:$0xf] (!%p132_p3) }
   0x7   : > { %135 = sbr.rel (%p132_p3) target bundleno = 390 (0x186), region = 28  ;;  %337 = vmatprep.subr.bf16.mxu0 (!%p132_p3), %v401_v0  ;;  %343 = vmatprep.mubr.msk.bf16.mxu0 (!%p132_p3), %vm402_vm0, %v401_v0  ;;  %vm192_vm2 = vcmask (!%p132_p3), 293888   ;;  %vm245_vm3 = vcmask (!%p132_p3), 7168   ;;  %vm247_vm4 = vcmask (!%p132_p3), 15360  }
   0xe   : > { %s462_s9 = smov (!%p156_p4, %s391_s9), 1 }
   0xf   : > { %s347_s13 = smul.u32 20, %s462_s9  ;;  %s326_s19 = sshll.u32 %s462_s9, 3 }
  0x10   : > { %s168_s22 = scalar_lea.vmem %s456_s2, %s326_s19 }
  0x11   : > { %s163_s16 = scalar_lea.vmem %s455_s1, %s347_s13 }
  0x12   : > { %v374_v1 = vld [vmem:[%s163_s16] sm:$0xff]   ;;  %v375_v2 = vld [vmem:[%s163_s16 + $0x8] sm:$0xff]   ;;  %v376_v3 = vld [vmem:[%s163_s16 + $0x10] ss:$0 sps:$4 sm:$0x33]  }
  0x13   : > { %338 = vmatpush3.bf16.msra.mxu0 %v374_v1  ;;  %v198_v4 = vsel %vm196_vm1, %v376_v3, 0 }
  0x14   : > { %339 = vmatprep.subr.bf16.mxu0 %v401_v0 }
  0x17   : > { %340 = vmatpush3.bf16.msra.mxu0 %v375_v2 }
  0x18   : > { %341 = vmatprep.subr.bf16.mxu0 %v401_v0 }
  0x1b   : > { %342 = vmatpush3.bf16.msra.mxu0 %v198_v4 }
  0x1e   : > { %344 = vmatmul.mubr.msk.bf16.vlgmr.msra.gmra.mrb[0].mxu0 %vm192_vm2, %v171_v5 }
  0xf1   : > { %v234_v6 = vpop.f32.mrb[0].mxu0 }
  0xf2   : > { %240 = vadd.xlane.f32.xlu0 %v234_v6  ;;  %v345_v7 = vpop.f32.mrb[1].mxu0  ;;  %v242_v10 = vmul.f32 %v234_v6, %v234_v6 }
  0xf3   : > { %v237_v8 = vpop.f32.mrb[2].mxu0 }
  0xf4   : > { %v346_v9 = vpop.f32.mrb[3].mxu0 }
  0xf6   : > { %243 = vadd.xlane.f32.xlu0 %v242_v10 }
 0x17f   : > { %v241_v11 = vpop.xlane.xlu0 %240 }
 0x183   : > { %v244_v12 = vpop.xlane.xlu0 %243 }
 0x184   : > { %v246_v13 = vsel %vm245_vm3, %v241_v11, %v244_v12 }
 0x185   : > { %248 = vst.msk [vmem:[%s168_s22] sm:$0xff] %vm247_vm4, %v246_v13 }
 0x186 PF: > { %s12_s11 = sadd.s32 1, %s399_s11   ;;  %s457_s9 = smov %s395_s10 }
 0x187   : > { %p9_p5 = scmp.ge.s32.totalorder %s12_s11, 4   ;;  %s458_s10 = smov %s460_s12 }
 0x189   :  { %11 = sbr.rel (!%p9_p5) target bundleno = 2 (0x2), region = 58 }

</bundles_post_ra>
